<compile_context>
chip_gen: v7x
topology: tpu7x:2x2x1
jax: 0.10.0
libtpu: 0.0.40
codegen_flags: <defaults>
</compile_context>

<pallas_src>
import functools

import jax
import jax.numpy as jnp
from jax.experimental import pallas as pl
from jax.experimental.pallas import tpu as pltpu


def _round_up(x, m):
    return ((x + m - 1) // m) * m


# ---------------------------------------------------------------------------
# Shared Pallas kernel: 3x3 / stride-2 conv block (parity-packed layout),
# expressed as 4 shift-offset matmuls, with fused bias + ReLU.
#   lo_ref : (1, L, Kin)     rows [i*L, (i+1)*L) of the packed input
#   hi_ref : (1, 2*S, Kin)   halo rows [(i+1)*L, (i+1)*L + 2*S)
#   w_ref  : (4, Kin, Nout)  packed weights, one matrix per (row,col) shift
#   b_ref  : (1, Nout)       bias (fp32)
#   o_ref  : (1, L, Nout)    packed output rows for this grid step
# ---------------------------------------------------------------------------
def _conv_block_kernel(lo_ref, hi_ref, w_ref, b_ref, o_ref, *, S):
    L = lo_ref.shape[1]
    n_out = o_ref.shape[2]
    xc = jnp.concatenate([lo_ref[0], hi_ref[0]], axis=0)          # (L + 2S, Kin)
    acc = jnp.zeros((L, n_out), jnp.float32) + b_ref[...]         # fp32 accumulator
    for j, off in enumerate((0, 1, S, S + 1)):                    # the 4 shifts
        acc = acc + jnp.dot(xc[off:off + L, :], w_ref[j],
                            preferred_element_type=jnp.float32)
    o_ref[0] = jnp.maximum(acc, 0.0).astype(o_ref.dtype)


def _conv_layer(z_in, w_packed, bias, *, S, TB, n_blocks, n_out, out_dtype):
    """z_in: (B, R, Kin) packed rows with R >= n_blocks*TB*S + 2*S."""
    B, _, Kin = z_in.shape
    L = TB * S
    kernel = functools.partial(_conv_block_kernel, S=S)
    return pl.pallas_call(
        kernel,
        out_shape=jax.ShapeDtypeStruct((B, n_blocks * L, n_out), out_dtype),
        grid=(B, n_blocks),
        in_specs=[
            pl.BlockSpec((1, L, Kin), lambda b, i: (b, i, 0)),
            pl.BlockSpec((1, 2 * S, Kin),
                         lambda b, i: (b, (i + 1) * (TB // 2), 0)),  # halo block
            pl.BlockSpec((4, Kin, n_out), lambda b, i: (0, 0, 0)),   # resident
            pl.BlockSpec((1, n_out), lambda b, i: (0, 0)),           # resident
        ],
        out_specs=pl.BlockSpec((1, L, n_out), lambda b, i: (b, i, 0)),
        compiler_params=pltpu.CompilerParams(
            dimension_semantics=("parallel", "parallel"),
            vmem_limit_bytes=32 * 1024 * 1024),
    )(z_in, z_in, w_packed, bias)


# ---------------------------------------------------------------------------
# Output Linear: M-tiled matmul + bias on the MXU (bf16 in, fp32 out).
# ---------------------------------------------------------------------------
def _matmul_bias_kernel(x_ref, w_ref, b_ref, o_ref):
    acc = jnp.dot(x_ref[...], w_ref[...], preferred_element_type=jnp.float32)
    o_ref[...] = (acc + b_ref[...]).astype(o_ref.dtype)


def linear_bias(x, w, b, *, tm):
    M, K = x.shape
    _, N = w.shape
    return pl.pallas_call(
        _matmul_bias_kernel,
        out_shape=jax.ShapeDtypeStruct((M, N), jnp.float32),
        grid=(M // tm,),
        in_specs=[
            pl.BlockSpec((tm, K), lambda i: (i, 0)),
            pl.BlockSpec((K, N), lambda i: (0, 0)),
            pl.BlockSpec((1, N), lambda i: (0, 0)),
        ],
        out_specs=pl.BlockSpec((tm, N), lambda i: (i, 0)),
        compiler_params=pltpu.CompilerParams(
            dimension_semantics=("parallel",),
            vmem_limit_bytes=32 * 1024 * 1024),
    )(x, w, b)


# ---------------------------------------------------------------------------
# Weight packing (small, trace-friendly glue).
# Parity convention: output/input parity group g = 2*p + q (p: row, q: col).
# Shift index j = 2*da + du with da, du in {0,1}; shift offset = da*S + du.
# ---------------------------------------------------------------------------
def _pack_conv1_weights(w1):
    # w1: (C, 1, 3, 3) OIHW  ->  (4, 16, 4*C)
    C = w1.shape[0]
    w1t = jnp.transpose(w1, (2, 3, 1, 0)).reshape(3, 3, C)        # (kh, kw, c)
    W = jnp.zeros((4, 16, 4 * C), jnp.float32)
    for p in range(2):
        for q in range(2):
            g = 2 * p + q
            for kh in range(3):
                for kw in range(3):
                    m, n = 2 * p + kh, 2 * q + kw
                    j = (m // 4) * 2 + (n // 4)
                    lane = (m % 4) * 4 + (n % 4)
                    W = W.at[j, lane, g * C:(g + 1) * C].set(w1t[kh, kw, :])
    return W


def _pack_conv2_weights(w2):
    # w2: (Cout, Cin, 3, 3) OIHW  ->  (4, 4*Cin, Cout)
    C = w2.shape[0]
    w2t = jnp.transpose(w2, (2, 3, 1, 0))                          # (kh, kw, cin, cout)
    W = jnp.zeros((4, 4 * C, C), jnp.float32)
    for kh in range(3):
        for kw in range(3):
            p, da = kh % 2, kh // 2
            q, du = kw % 2, kw // 2
            g = 2 * p + q
            j = 2 * da + du
            W = W.at[j, g * C:(g + 1) * C, :].set(w2t[kh, kw, :, :])
    return W


# ---------------------------------------------------------------------------
# Module forward:  x (B, T, idim)  ->  ((1, B*H2, d_model), x_len=[H2])
# ---------------------------------------------------------------------------
def conv2d_subsampling_forward(x, params):
    B, T, idim = x.shape
    w1, b1, w2, b2, wo, bo = (params[k] for k in ("w1", "b1", "w2", "b2", "wo", "bo"))
    C = w1.shape[0]
    d_model = wo.shape[0]

    # Conv geometry (kernel=3, stride=2, VALID), as in the PyTorch module.
    H1 = (T - 3) // 2 + 1
    F1 = (idim - 3) // 2 + 1
    H2 = (H1 - 3) // 2 + 1
    F2 = (F1 - 3) // 2 + 1

    # Parity-packed ("slot") geometry shared by both conv kernels.
    Fh = (F1 + 1) // 2                        # width slots of the conv1 output grid
    S = _round_up(Fh + 1, 4)                  # inner slot count (keeps blocks 8-aligned)
    TB = 8 if H2 <= 32 else (32 if H2 <= 256 else 64)   # time rows per grid block (even)
    L = TB * S
    n2 = pl.cdiv(H2, TB)                      # conv2 grid blocks over h2 rows
    n1 = n2 + 1                               # conv1 also produces conv2's halo rows

    # ---- glue: phase-4 packing of the raw input (pad / reshape / transpose only) ----
    A4 = n1 * TB + 2
    Tpad, Fpad = 4 * A4, 4 * S
    xp = jnp.pad(x, ((0, 0), (0, Tpad - T), (0, Fpad - idim)))
    xp = xp.reshape(B, A4, 4, S, 4).transpose(0, 1, 3, 2, 4)       # (B, A4, S, 4, 4)
    x_packed = xp.reshape(B, A4 * S, 16).astype(jnp.bfloat16)

    # ---- packed weights / biases ----
    w1p = _pack_conv1_weights(w1).astype(jnp.bfloat16)             # (4, 16, 4C)
    b1p = jnp.tile(b1.reshape(1, C), (1, 4)).astype(jnp.float32)   # (1, 4C)
    w2p = _pack_conv2_weights(w2).astype(jnp.bfloat16)             # (4, 4C, C)
    b2p = b2.reshape(1, C).astype(jnp.float32)

    # ---- conv1 (+ReLU): writes y1 directly in the parity-packed layout ----
    z = _conv_layer(x_packed, w1p, b1p, S=S, TB=TB, n_blocks=n1,
                    n_out=4 * C, out_dtype=jnp.bfloat16)           # (B, n1*L, 4C)

    # ---- conv2 (+ReLU) ----
    y2 = _conv_layer(z, w2p, b2p, S=S, TB=TB, n_blocks=n2,
                     n_out=C, out_dtype=jnp.bfloat16)              # (B, n2*L, C)

    # ---- flatten to PyTorch's (C, W2) feature order + output Linear ----
    y2 = y2.reshape(B, n2 * TB, S, C)[:, :H2, :F2, :]              # (B, H2, F2, C)
    feat = jnp.transpose(y2, (0, 1, 3, 2)).reshape(B * H2, C * F2)
    M = B * H2
    TM = min(256, _round_up(M, 8))
    Mp = _round_up(M, TM)
    feat = jnp.pad(feat, ((0, Mp - M), (0, 0)))
    out = linear_bias(feat.astype(jnp.bfloat16),
                      jnp.transpose(wo).astype(jnp.bfloat16),
                      bo.reshape(1, d_model).astype(jnp.float32), tm=TM)
    out = out[:M].reshape(1, B * H2, d_model)

    # TODO(synk): x_len in the PyTorch code is a host-side shape scalar; returned
    # here as a length-1 int32 array rather than computed in a kernel.
    x_len = jnp.array([H2], dtype=jnp.int32)
    return out, x_len


# ---------------------------------------------------------------------------
# Deterministic synthetic parameters (shapes from the module's __init__).
# ---------------------------------------------------------------------------
def init_params(key, idim, d_model, out_channels=32):
    subsample_idim = ((idim - 1) // 2 - 1) // 2
    out_size = out_channels * subsample_idim
    ks = jax.random.split(key, 6)
    return dict(
        w1=jax.random.normal(ks[0], (out_channels, 1, 3, 3), jnp.float32) * 0.1,
        b1=jax.random.normal(ks[1], (out_channels,), jnp.float32) * 0.1,
        w2=jax.random.normal(ks[2], (out_channels, out_channels, 3, 3), jnp.float32) * 0.05,
        b2=jax.random.normal(ks[3], (out_channels,), jnp.float32) * 0.05,
        wo=jax.random.normal(ks[4], (d_model, out_size), jnp.float32) * 0.05,
        bo=jax.random.normal(ks[5], (d_model,), jnp.float32) * 0.05,
    )


# ---------------------------------------------------------------------------
# Pure-JAX reference (matches the PyTorch forward) for correctness checking.
# ---------------------------------------------------------------------------
def reference_forward(x, params):
    w1, b1, w2, b2, wo, bo = (params[k] for k in ("w1", "b1", "w2", "b2", "wo", "bo"))
    dn = ("NCHW", "OIHW", "NCHW")
    y = x[:, None, :, :]                                           # unsqueeze(1)
    y = jax.lax.conv_general_dilated(y, w1, (2, 2), "VALID", dimension_numbers=dn)
    y = jnp.maximum(y + b1[None, :, None, None], 0.0)
    y = jax.lax.conv_general_dilated(y, w2, (2, 2), "VALID", dimension_numbers=dn)
    y = jnp.maximum(y + b2[None, :, None, None], 0.0)
    B, C, H2, W2 = y.shape
    y = jnp.transpose(y, (0, 2, 1, 3)).reshape(1, B * H2, C * W2)
    return y @ wo.T + bo, jnp.array([H2], dtype=jnp.int32)


if __name__ == "__main__":
    # Small shapes consistent with the module: batch=2, seq(T)=16, idim=16,
    # out_channels=8, d_model=32.
    B, T, IDIM, C, DMODEL = 2, 16, 16, 8, 32

    key = jax.random.PRNGKey(0)
    kx, kp = jax.random.split(key)
    x = jax.random.normal(kx, (B, T, IDIM), jnp.float32)
    params = init_params(kp, IDIM, DMODEL, out_channels=C)

    fwd = jax.jit(conv2d_subsampling_forward)
    out, x_len = fwd(x, params)
    out = jax.block_until_ready(out)
    x_len = jax.block_until_ready(x_len)

    ref_out, ref_len = reference_forward(x, params)
    assert out.shape == ref_out.shape, (out.shape, ref_out.shape)
    max_err = float(jnp.max(jnp.abs(out - ref_out)))
    # bf16 MXU inputs with fp32 accumulation -> relaxed tolerance.
    assert max_err < 2e-2, f"mismatch vs reference, max_err={max_err}"
    assert int(x_len[0]) == int(ref_len[0])

    print("KERNEL_OK")
</pallas_src>

<mosaic_0001>
module attributes {stable_mosaic.version = 11 : i64} {
  func.func @_conv_block_kernel(%arg0: i32, %arg1: i32, %arg2: memref<1x64x16xbf16, #tpu.memory_space<vmem>>, %arg3: memref<1x16x16xbf16, #tpu.memory_space<vmem>>, %arg4: memref<4x16x32xbf16, #tpu.memory_space<vmem>>, %arg5: memref<1x32xf32, #tpu.memory_space<vmem>>, %arg6: memref<1x64x32xbf16, #tpu.memory_space<vmem>>) attributes {dimension_semantics = [#tpu.dimension_semantics<parallel>, #tpu.dimension_semantics<parallel>], iteration_bounds = array<i64: 2, 2>, scalar_prefetch = 0 : i64, scratch_operands = 0 : i64, tpu.core_type = #tpu.core_type<tc>, window_params = [{transform_indices = @transform_0, window_bounds = array<i64: 1, 64, 16>}, {transform_indices = @transform_1, window_bounds = array<i64: 1, 16, 16>}, {pipeline_mode = #tpu.pipeline_mode<synchronous>, transform_indices = @transform_2, window_bounds = array<i64: 4, 16, 32>}, {pipeline_mode = #tpu.pipeline_mode<synchronous>, transform_indices = @transform_3, window_bounds = array<i64: 1, 32>}, {transform_indices = @transform_4, window_bounds = array<i64: 1, 64, 32>}]} {
    %c0 = arith.constant 0 : index
    %c0_0 = arith.constant 0 : index
    %c0_1 = arith.constant 0 : index
    %0 = vector.load %arg2[%c0, %c0_0, %c0_1] : memref<1x64x16xbf16, #tpu.memory_space<vmem>>, vector<1x64x16xbf16>
    %1 = vector.shape_cast %0 : vector<1x64x16xbf16> to vector<64x16xbf16>
    %c0_2 = arith.constant 0 : index
    %c0_3 = arith.constant 0 : index
    %c0_4 = arith.constant 0 : index
    %2 = vector.load %arg3[%c0_2, %c0_3, %c0_4] : memref<1x16x16xbf16, #tpu.memory_space<vmem>>, vector<1x16x16xbf16>
    %3 = vector.shape_cast %2 : vector<1x16x16xbf16> to vector<16x16xbf16>
    %4 = tpu.concatenate %1, %3 in 0 : vector<64x16xbf16>, vector<16x16xbf16> -> vector<80x16xbf16>
    %cst = arith.constant 0.000000e+00 : f32
    %5 = vector.broadcast %cst : f32 to vector<64x32xf32>
    %c0_5 = arith.constant 0 : index
    %c0_6 = arith.constant 0 : index
    %6 = vector.load %arg5[%c0_5, %c0_6] : memref<1x32xf32, #tpu.memory_space<vmem>>, vector<1x32xf32>
    %7 = vector.broadcast %6 : vector<1x32xf32> to vector<64x32xf32>
    %8 = arith.addf %5, %7 : vector<64x32xf32>
    %9 = vector.extract_strided_slice %4 {offsets = [0, 0], sizes = [64, 16], strides = [1, 1]} : vector<80x16xbf16> to vector<64x16xbf16>
    %c0_7 = arith.constant 0 : index
    %c0_8 = arith.constant 0 : index
    %c0_9 = arith.constant 0 : index
    %10 = vector.load %arg4[%c0_7, %c0_8, %c0_9] : memref<4x16x32xbf16, #tpu.memory_space<vmem>>, vector<1x16x32xbf16>
    %11 = vector.shape_cast %10 : vector<1x16x32xbf16> to vector<16x32xbf16>
    %cst_10 = arith.constant dense<0.000000e+00> : vector<64x32xf32>
    %12 = tpu.matmul %9, %11, %cst_10 {dimension_numbers = #tpu.dot_dimension_numbers<[1], [0], [0], [1], [0, 0, 1, 1], [], []>} : vector<64x16xbf16>, vector<16x32xbf16>, vector<64x32xf32> -> vector<64x32xf32>
    %13 = arith.addf %8, %12 : vector<64x32xf32>
    %14 = vector.extract_strided_slice %4 {offsets = [1, 0], sizes = [64, 16], strides = [1, 1]} : vector<80x16xbf16> to vector<64x16xbf16>
    %c1 = arith.constant 1 : index
    %c0_11 = arith.constant 0 : index
    %c0_12 = arith.constant 0 : index
    %15 = vector.load %arg4[%c1, %c0_11, %c0_12] : memref<4x16x32xbf16, #tpu.memory_space<vmem>>, vector<1x16x32xbf16>
    %16 = vector.shape_cast %15 : vector<1x16x32xbf16> to vector<16x32xbf16>
    %cst_13 = arith.constant dense<0.000000e+00> : vector<64x32xf32>
    %17 = tpu.matmul %14, %16, %cst_13 {dimension_numbers = #tpu.dot_dimension_numbers<[1], [0], [0], [1], [0, 0, 1, 1], [], []>} : vector<64x16xbf16>, vector<16x32xbf16>, vector<64x32xf32> -> vector<64x32xf32>
    %18 = arith.addf %13, %17 : vector<64x32xf32>
    %19 = vector.extract_strided_slice %4 {offsets = [8, 0], sizes = [64, 16], strides = [1, 1]} : vector<80x16xbf16> to vector<64x16xbf16>
    %c2 = arith.constant 2 : index
    %c0_14 = arith.constant 0 : index
    %c0_15 = arith.constant 0 : index
    %20 = vector.load %arg4[%c2, %c0_14, %c0_15] : memref<4x16x32xbf16, #tpu.memory_space<vmem>>, vector<1x16x32xbf16>
    %21 = vector.shape_cast %20 : vector<1x16x32xbf16> to vector<16x32xbf16>
    %cst_16 = arith.constant dense<0.000000e+00> : vector<64x32xf32>
    %22 = tpu.matmul %19, %21, %cst_16 {dimension_numbers = #tpu.dot_dimension_numbers<[1], [0], [0], [1], [0, 0, 1, 1], [], []>} : vector<64x16xbf16>, vector<16x32xbf16>, vector<64x32xf32> -> vector<64x32xf32>
    %23 = arith.addf %18, %22 : vector<64x32xf32>
    %24 = vector.extract_strided_slice %4 {offsets = [9, 0], sizes = [64, 16], strides = [1, 1]} : vector<80x16xbf16> to vector<64x16xbf16>
    %c3 = arith.constant 3 : index
    %c0_17 = arith.constant 0 : index
    %c0_18 = arith.constant 0 : index
    %25 = vector.load %arg4[%c3, %c0_17, %c0_18] : memref<4x16x32xbf16, #tpu.memory_space<vmem>>, vector<1x16x32xbf16>
    %26 = vector.shape_cast %25 : vector<1x16x32xbf16> to vector<16x32xbf16>
    %cst_19 = arith.constant dense<0.000000e+00> : vector<64x32xf32>
    %27 = tpu.matmul %24, %26, %cst_19 {dimension_numbers = #tpu.dot_dimension_numbers<[1], [0], [0], [1], [0, 0, 1, 1], [], []>} : vector<64x16xbf16>, vector<16x32xbf16>, vector<64x32xf32> -> vector<64x32xf32>
    %28 = arith.addf %23, %27 : vector<64x32xf32>
    %cst_20 = arith.constant 0.000000e+00 : f32
    %29 = vector.broadcast %cst_20 : f32 to vector<64x32xf32>
    %30 = arith.maximumf %28, %29 : vector<64x32xf32>
    %31 = arith.truncf %30 : vector<64x32xf32> to vector<64x32xbf16>
    %c0_21 = arith.constant 0 : index
    %c0_22 = arith.constant 0 : index
    %c0_23 = arith.constant 0 : index
    %32 = vector.load %arg6[%c0_21, %c0_22, %c0_23] : memref<1x64x32xbf16, #tpu.memory_space<vmem>>, vector<1x64x32xbf16>
    %33 = vector.shape_cast %32 : vector<1x64x32xbf16> to vector<64x32xbf16>
    %34 = vector.shape_cast %31 : vector<64x32xbf16> to vector<1x64x32xbf16>
    tpu.vector_store %arg6[%c0_21, %c0_22, %c0_23], %34 {strides = array<i32>} : memref<1x64x32xbf16, #tpu.memory_space<vmem>>, vector<1x64x32xbf16>,
    return
  }
  func.func @transform_0(%arg0: i32, %arg1: i32) -> (i32, i32, i32) {
    %c0_i32 = arith.constant 0 : i32
    %c0_i32_0 = arith.constant 0 : i32
    return %arg0, %arg1, %c0_i32 : i32, i32, i32
  }
  func.func @transform_1(%arg0: i32, %arg1: i32) -> (i32, i32, i32) {
    %c1_i32 = arith.constant 1 : i32
    %0 = arith.addi %arg1, %c1_i32 : i32
    %c4_i32 = arith.constant 4 : i32
    %1 = arith.muli %0, %c4_i32 : i32
    %c0_i32 = arith.constant 0 : i32
    %c0_i32_0 = arith.constant 0 : i32
    return %arg0, %1, %c0_i32 : i32, i32, i32
  }
  func.func @transform_2(%arg0: i32, %arg1: i32) -> (i32, i32, i32) {
    %c0_i32 = arith.constant 0 : i32
    %c0_i32_0 = arith.constant 0 : i32
    %c0_i32_1 = arith.constant 0 : i32
    %c0_i32_2 = arith.constant 0 : i32
    return %c0_i32, %c0_i32_0, %c0_i32_1 : i32, i32, i32
  }
  func.func @transform_3(%arg0: i32, %arg1: i32) -> (i32, i32) {
    %c0_i32 = arith.constant 0 : i32
    %c0_i32_0 = arith.constant 0 : i32
    %c0_i32_1 = arith.constant 0 : i32
    return %c0_i32, %c0_i32_0 : i32, i32
  }
  func.func @transform_4(%arg0: i32, %arg1: i32) -> (i32, i32, i32) {
    %c0_i32 = arith.constant 0 : i32
    %c0_i32_0 = arith.constant 0 : i32
    return %arg0, %arg1, %c0_i32 : i32, i32, i32
  }
}

module attributes {stable_mosaic.version = 11 : i64} {
  func.func @_matmul_bias_kernel(%arg0: i32, %arg1: memref<8x24xbf16, #tpu.memory_space<vmem>>, %arg2: memref<24x32xbf16, #tpu.memory_space<vmem>>, %arg3: memref<1x32xf32, #tpu.memory_space<vmem>>, %arg4: memref<8x32xf32, #tpu.memory_space<vmem>>) attributes {dimension_semantics = [#tpu.dimension_semantics<parallel>], iteration_bounds = array<i64: 1>, scalar_prefetch = 0 : i64, scratch_operands = 0 : i64, tpu.core_type = #tpu.core_type<tc>, window_params = [{transform_indices = @transform_0, window_bounds = array<i64: 8, 24>}, {pipeline_mode = #tpu.pipeline_mode<synchronous>, transform_indices = @transform_1, window_bounds = array<i64: 24, 32>}, {pipeline_mode = #tpu.pipeline_mode<synchronous>, transform_indices = @transform_2, window_bounds = array<i64: 1, 32>}, {transform_indices = @transform_3, window_bounds = array<i64: 8, 32>}]} {
    %c0 = arith.constant 0 : index
    %c0_0 = arith.constant 0 : index
    %0 = vector.load %arg1[%c0, %c0_0] : memref<8x24xbf16, #tpu.memory_space<vmem>>, vector<8x24xbf16>
    %c0_1 = arith.constant 0 : index
    %c0_2 = arith.constant 0 : index
    %1 = vector.load %arg2[%c0_1, %c0_2] : memref<24x32xbf16, #tpu.memory_space<vmem>>, vector<24x32xbf16>
    %cst = arith.constant dense<0.000000e+00> : vector<8x32xf32>
    %2 = tpu.matmul %0, %1, %cst {dimension_numbers = #tpu.dot_dimension_numbers<[1], [0], [0], [1], [0, 0, 1, 1], [], []>} : vector<8x24xbf16>, vector<24x32xbf16>, vector<8x32xf32> -> vector<8x32xf32>
    %c0_3 = arith.constant 0 : index
    %c0_4 = arith.constant 0 : index
    %3 = vector.load %arg3[%c0_3, %c0_4] : memref<1x32xf32, #tpu.memory_space<vmem>>, vector<1x32xf32>
    %4 = vector.broadcast %3 : vector<1x32xf32> to vector<8x32xf32>
    %5 = arith.addf %2, %4 : vector<8x32xf32>
    %c0_5 = arith.constant 0 : index
    %c0_6 = arith.constant 0 : index
    %6 = vector.load %arg4[%c0_5, %c0_6] : memref<8x32xf32, #tpu.memory_space<vmem>>, vector<8x32xf32>
    tpu.vector_store %arg4[%c0_5, %c0_6], %5 {strides = array<i32>} : memref<8x32xf32, #tpu.memory_space<vmem>>, vector<8x32xf32>,
    return
  }
  func.func @transform_0(%arg0: i32) -> (i32, i32) {
    %c0_i32 = arith.constant 0 : i32
    %c0_i32_0 = arith.constant 0 : i32
    return %arg0, %c0_i32 : i32, i32
  }
  func.func @transform_1(%arg0: i32) -> (i32, i32) {
    %c0_i32 = arith.constant 0 : i32
    %c0_i32_0 = arith.constant 0 : i32
    %c0_i32_1 = arith.constant 0 : i32
    return %c0_i32, %c0_i32_0 : i32, i32
  }
  func.func @transform_2(%arg0: i32) -> (i32, i32) {
    %c0_i32 = arith.constant 0 : i32
    %c0_i32_0 = arith.constant 0 : i32
    %c0_i32_1 = arith.constant 0 : i32
    return %c0_i32, %c0_i32_0 : i32, i32
  }
  func.func @transform_3(%arg0: i32) -> (i32, i32) {
    %c0_i32 = arith.constant 0 : i32
    %c0_i32_0 = arith.constant 0 : i32
    return %arg0, %c0_i32 : i32, i32
  }
}

module attributes {stable_mosaic.version = 11 : i64} {
  func.func @_conv_block_kernel(%arg0: i32, %arg1: i32, %arg2: memref<1x64x32xbf16, #tpu.memory_space<vmem>>, %arg3: memref<1x16x32xbf16, #tpu.memory_space<vmem>>, %arg4: memref<4x32x8xbf16, #tpu.memory_space<vmem>>, %arg5: memref<1x8xf32, #tpu.memory_space<vmem>>, %arg6: memref<1x64x8xbf16, #tpu.memory_space<vmem>>) attributes {dimension_semantics = [#tpu.dimension_semantics<parallel>, #tpu.dimension_semantics<parallel>], iteration_bounds = array<i64: 2, 1>, scalar_prefetch = 0 : i64, scratch_operands = 0 : i64, tpu.core_type = #tpu.core_type<tc>, window_params = [{transform_indices = @transform_0, window_bounds = array<i64: 1, 64, 32>}, {transform_indices = @transform_1, window_bounds = array<i64: 1, 16, 32>}, {pipeline_mode = #tpu.pipeline_mode<synchronous>, transform_indices = @transform_2, window_bounds = array<i64: 4, 32, 8>}, {pipeline_mode = #tpu.pipeline_mode<synchronous>, transform_indices = @transform_3, window_bounds = array<i64: 1, 8>}, {transform_indices = @transform_4, window_bounds = array<i64: 1, 64, 8>}]} {
    %c0 = arith.constant 0 : index
    %c0_0 = arith.constant 0 : index
    %c0_1 = arith.constant 0 : index
    %0 = vector.load %arg2[%c0, %c0_0, %c0_1] : memref<1x64x32xbf16, #tpu.memory_space<vmem>>, vector<1x64x32xbf16>
    %1 = vector.shape_cast %0 : vector<1x64x32xbf16> to vector<64x32xbf16>
    %c0_2 = arith.constant 0 : index
    %c0_3 = arith.constant 0 : index
    %c0_4 = arith.constant 0 : index
    %2 = vector.load %arg3[%c0_2, %c0_3, %c0_4] : memref<1x16x32xbf16, #tpu.memory_space<vmem>>, vector<1x16x32xbf16>
    %3 = vector.shape_cast %2 : vector<1x16x32xbf16> to vector<16x32xbf16>
    %4 = tpu.concatenate %1, %3 in 0 : vector<64x32xbf16>, vector<16x32xbf16> -> vector<80x32xbf16>
    %cst = arith.constant 0.000000e+00 : f32
    %5 = vector.broadcast %cst : f32 to vector<64x8xf32>
    %c0_5 = arith.constant 0 : index
    %c0_6 = arith.constant 0 : index
    %6 = vector.load %arg5[%c0_5, %c0_6] : memref<1x8xf32, #tpu.memory_space<vmem>>, vector<1x8xf32>
    %7 = vector.broadcast %6 : vector<1x8xf32> to vector<64x8xf32>
    %8 = arith.addf %5, %7 : vector<64x8xf32>
    %9 = vector.extract_strided_slice %4 {offsets = [0, 0], sizes = [64, 32], strides = [1, 1]} : vector<80x32xbf16> to vector<64x32xbf16>
    %c0_7 = arith.constant 0 : index
    %c0_8 = arith.constant 0 : index
    %c0_9 = arith.constant 0 : index
    %10 = vector.load %arg4[%c0_7, %c0_8, %c0_9] : memref<4x32x8xbf16, #tpu.memory_space<vmem>>, vector<1x32x8xbf16>
    %11 = vector.shape_cast %10 : vector<1x32x8xbf16> to vector<32x8xbf16>
    %cst_10 = arith.constant dense<0.000000e+00> : vector<64x8xf32>
    %12 = tpu.matmul %9, %11, %cst_10 {dimension_numbers = #tpu.dot_dimension_numbers<[1], [0], [0], [1], [0, 0, 1, 1], [], []>} : vector<64x32xbf16>, vector<32x8xbf16>, vector<64x8xf32> -> vector<64x8xf32>
    %13 = arith.addf %8, %12 : vector<64x8xf32>
    %14 = vector.extract_strided_slice %4 {offsets = [1, 0], sizes = [64, 32], strides = [1, 1]} : vector<80x32xbf16> to vector<64x32xbf16>
    %c1 = arith.constant 1 : index
    %c0_11 = arith.constant 0 : index
    %c0_12 = arith.constant 0 : index
    %15 = vector.load %arg4[%c1, %c0_11, %c0_12] : memref<4x32x8xbf16, #tpu.memory_space<vmem>>, vector<1x32x8xbf16>
    %16 = vector.shape_cast %15 : vector<1x32x8xbf16> to vector<32x8xbf16>
    %cst_13 = arith.constant dense<0.000000e+00> : vector<64x8xf32>
    %17 = tpu.matmul %14, %16, %cst_13 {dimension_numbers = #tpu.dot_dimension_numbers<[1], [0], [0], [1], [0, 0, 1, 1], [], []>} : vector<64x32xbf16>, vector<32x8xbf16>, vector<64x8xf32> -> vector<64x8xf32>
    %18 = arith.addf %13, %17 : vector<64x8xf32>
    %19 = vector.extract_strided_slice %4 {offsets = [8, 0], sizes = [64, 32], strides = [1, 1]} : vector<80x32xbf16> to vector<64x32xbf16>
    %c2 = arith.constant 2 : index
    %c0_14 = arith.constant 0 : index
    %c0_15 = arith.constant 0 : index
    %20 = vector.load %arg4[%c2, %c0_14, %c0_15] : memref<4x32x8xbf16, #tpu.memory_space<vmem>>, vector<1x32x8xbf16>
    %21 = vector.shape_cast %20 : vector<1x32x8xbf16> to vector<32x8xbf16>
    %cst_16 = arith.constant dense<0.000000e+00> : vector<64x8xf32>
    %22 = tpu.matmul %19, %21, %cst_16 {dimension_numbers = #tpu.dot_dimension_numbers<[1], [0], [0], [1], [0, 0, 1, 1], [], []>} : vector<64x32xbf16>, vector<32x8xbf16>, vector<64x8xf32> -> vector<64x8xf32>
    %23 = arith.addf %18, %22 : vector<64x8xf32>
    %24 = vector.extract_strided_slice %4 {offsets = [9, 0], sizes = [64, 32], strides = [1, 1]} : vector<80x32xbf16> to vector<64x32xbf16>
    %c3 = arith.constant 3 : index
    %c0_17 = arith.constant 0 : index
    %c0_18 = arith.constant 0 : index
    %25 = vector.load %arg4[%c3, %c0_17, %c0_18] : memref<4x32x8xbf16, #tpu.memory_space<vmem>>, vector<1x32x8xbf16>
    %26 = vector.shape_cast %25 : vector<1x32x8xbf16> to vector<32x8xbf16>
    %cst_19 = arith.constant dense<0.000000e+00> : vector<64x8xf32>
    %27 = tpu.matmul %24, %26, %cst_19 {dimension_numbers = #tpu.dot_dimension_numbers<[1], [0], [0], [1], [0, 0, 1, 1], [], []>} : vector<64x32xbf16>, vector<32x8xbf16>, vector<64x8xf32> -> vector<64x8xf32>
    %28 = arith.addf %23, %27 : vector<64x8xf32>
    %cst_20 = arith.constant 0.000000e+00 : f32
    %29 = vector.broadcast %cst_20 : f32 to vector<64x8xf32>
    %30 = arith.maximumf %28, %29 : vector<64x8xf32>
    %31 = arith.truncf %30 : vector<64x8xf32> to vector<64x8xbf16>
    %c0_21 = arith.constant 0 : index
    %c0_22 = arith.constant 0 : index
    %c0_23 = arith.constant 0 : index
    %32 = vector.load %arg6[%c0_21, %c0_22, %c0_23] : memref<1x64x8xbf16, #tpu.memory_space<vmem>>, vector<1x64x8xbf16>
    %33 = vector.shape_cast %32 : vector<1x64x8xbf16> to vector<64x8xbf16>
    %34 = vector.shape_cast %31 : vector<64x8xbf16> to vector<1x64x8xbf16>
    tpu.vector_store %arg6[%c0_21, %c0_22, %c0_23], %34 {strides = array<i32>} : memref<1x64x8xbf16, #tpu.memory_space<vmem>>, vector<1x64x8xbf16>,
    return
  }
  func.func @transform_0(%arg0: i32, %arg1: i32) -> (i32, i32, i32) {
    %c0_i32 = arith.constant 0 : i32
    %c0_i32_0 = arith.constant 0 : i32
    return %arg0, %arg1, %c0_i32 : i32, i32, i32
  }
  func.func @transform_1(%arg0: i32, %arg1: i32) -> (i32, i32, i32) {
    %c1_i32 = arith.constant 1 : i32
    %0 = arith.addi %arg1, %c1_i32 : i32
    %c4_i32 = arith.constant 4 : i32
    %1 = arith.muli %0, %c4_i32 : i32
    %c0_i32 = arith.constant 0 : i32
    %c0_i32_0 = arith.constant 0 : i32
    return %arg0, %1, %c0_i32 : i32, i32, i32
  }
  func.func @transform_2(%arg0: i32, %arg1: i32) -> (i32, i32, i32) {
    %c0_i32 = arith.constant 0 : i32
    %c0_i32_0 = arith.constant 0 : i32
    %c0_i32_1 = arith.constant 0 : i32
    %c0_i32_2 = arith.constant 0 : i32
    return %c0_i32, %c0_i32_0, %c0_i32_1 : i32, i32, i32
  }
  func.func @transform_3(%arg0: i32, %arg1: i32) -> (i32, i32) {
    %c0_i32 = arith.constant 0 : i32
    %c0_i32_0 = arith.constant 0 : i32
    %c0_i32_1 = arith.constant 0 : i32
    return %c0_i32, %c0_i32_0 : i32, i32
  }
  func.func @transform_4(%arg0: i32, %arg1: i32) -> (i32, i32, i32) {
    %c0_i32 = arith.constant 0 : i32
    %c0_i32_0 = arith.constant 0 : i32
    return %arg0, %arg1, %c0_i32 : i32, i32, i32
  }
}

</mosaic_0001>

<bundles_post_ra>
// kernel: conv2d_subsampling_forward.3
= control target key start
LH: loop header
LB: loop body
LE: loop exit
PB: predicated region body
PF: predicated region fallthrough
CT: control target
= control target key end

     0   :  { %s1230_s15 = smov 0   ;;  %s1232_s16 = smov 0   ;;  %s1356_s0 = inlined_call_operand.vmem [shape: bf16[2,144,16], index: 0, kind: input, shape index: {}, may-alias: {0,1}]   ;;  %s1357_s1 = inlined_call_operand.vmem [shape: bf16[2,144,16], index: 1, kind: input, shape index: {}, may-alias: {0,1}]   ;;  %s1358_s2 = inlined_call_operand.vmem [shape: bf16[4,16,32], index: 2, kind: input, shape index: {}]   ;;  %s1359_s3 = inlined_call_operand.vmem [shape: f32[1,32], index: 3, kind: input, shape index: {}]   ;;  %s1360_s4 = inlined_call_operand.vmem [shape: bf16[2,128,32], index: 4, kind: output, shape index: {}]  }
   0x1   :  { %s1234_s17 = smov 0   ;;  %s1236_s18 = smov 0  }
   0x2   :  { %s1238_s19 = smov 0  }
   0x3 LB: > { %s23_s20 = sadd.s32 1, %s1195_s17  ;;  %s26_s21 = sadd.s32 1, %s1199_s18  ;;  %s1203_s19 = sphi %s1238_s19, %s14_s19   ;;  %s1199_s18 = sphi %s1236_s18, %s1364_s18   ;;  %s1195_s17 = sphi %s1234_s17, %s1363_s17   ;;  %s1191_s16 = sphi %s1232_s16, %s1362_s16   ;;  %s1187_s15 = sphi %s1230_s15, %s1361_s15  }
   0x4   : > { %p24_p0 = scmp.ge.s32.totalorder %s23_s20, 2  ;;  %p955_p1 = scmp.ge.s32.totalorder %s1203_s19, 1 }
   0x5   : > { %p216_p2 = scmp.lt.s32.totalorder %s1203_s19, 5 }
   0x6   : > { %s1366_s20 = smov (%p24_p0, %s23_s20), 0  ;;  %s1368_s21 = smov (!%p24_p0, %s26_s21), %s1199_s18 }
   0x7   : > { %p217_p3 = pnand %p955_p1, %p216_p2  ;;  %p28_p4 = scmp.ge.s32.totalorder %s1368_s21, 2 }
   0x8   : > { %v1156_v0 = vld [vmem:[%s1358_s2] sm:$0xff] (!%p217_p3)   ;;  %s1263_s24 = sshll.u32 (!%p217_p3), %s1187_s15, 3  ;;  %v1157_v1 = vld [vmem:[%s1358_s2 + $0x10] sm:$0xff] (!%p217_p3)   ;;  %p270_p5 = scmp.lt.s32.totalorder (!%p217_p3), %s1191_s16, 1  ;;  %v1160_v2 = vld [vmem:[%s1358_s2 + $0x8] sm:$0xff] (!%p217_p3)   ;;  %vm359_vm0 = vcmask (!%p217_p3), 130048  }
   0x9   : > { %s1370_s21 = smov (%p28_p4, %s1368_s21), 0  ;;  %220 = sbr.rel (%p217_p3) target bundleno = 274 (0x112), region = 36 }
   0xa   : > { %1043 = vmatprep.subr.bf16.mxu1 (!%p217_p3), %v1156_v0  ;;  %p272_p6 = scmp.lt.s32.totalorder (!%p217_p3), %s1263_s24, 17  ;;  %1063 = vmatprep.subr.bf16.mxu0 (!%p217_p3), %v1157_v1  ;;  %v1161_v3 = vld [vmem:[%s1358_s2 + $0x18] sm:$0xff] (!%p217_p3)   ;;  %s1022_s7 = sadd.s32 (!%p217_p3), 8, %s1263_s24  ;;  %vm575_vm1 = vcmask (!%p217_p3), 1043456   ;;  %vm448_vm2 = vsmask.f32 (!%p217_p3), 7424 }
   0xb   : > { %1044 = vmatpush3.bf16.msra.mxu1 (!%p217_p3), %v1156_v0  ;;  %1064 = vmatpush3.bf16.msra.mxu0 (!%p217_p3), %v1157_v1  ;;  %p288_p7 = scmp.lt.s32.totalorder (!%p217_p3), %s1022_s7, 17  ;;  %vm679_vm3 = vsmask.f32 (!%p217_p3), 3328  ;;  %p300_p8 = scmp.lt.s32.totalorder (!%p217_p3), %s1263_s24, 15  ;;  %v969_v60 = vld [vmem:[%s1359_s3] ss:$0 sm:$0xff] (!%p217_p3) }
   0xc   : > { %1053 = vmatprep.subr.bf16.mxu1 (!%p217_p3), %v1160_v2  ;;  %1073 = vmatprep.subr.bf16.mxu0 (!%p217_p3), %v1161_v3  ;;  %vm832_vm4 = vcmask (!%p217_p3), 257024  }
  0x10   : > { %s1372_s16 = smov (!%p270_p5, %s1191_s16), 1  ;;  %s1374_s7 = smov (!%p288_p7, %s1022_s7), 17 }
  0x11   : > { %s273_s5 = scalar_select %p272_p6, %s1263_s24, 17 }
  0x12   : > { %s1115_s6 = smul.u32 18, %s1372_s16  ;;  %s1376_s24 = smov (!%p300_p8, %s1263_s24), 15 }
  0x13   : > { %s962_s27 = sshll.u32 %s1372_s16, 4 }
  0x14   : > { %s275_s8 = sadd.s32 %s1115_s6, %s273_s5  ;;  %s291_s13 = sadd.s32 %s1115_s6, %s1374_s7 }
  0x15   : > { %s957_s9 = sshll.u32 %s275_s8, 2  ;;  %s960_s14 = sshll.u32 %s291_s13, 2 }
  0x16   : > { %s277_s12 = scalar_lea.vmem %s1356_s0, %s957_s9  ;;  %s293_s23 = scalar_lea.vmem %s1357_s1, %s960_s14 }
  0x17   : > { %v1158_v4 = vld [vmem:[%s277_s12] sm:$0xff]   ;;  %v1159_v5 = vld [vmem:[%s277_s12 + $0x8] sm:$0xff]   ;;  %v1162_v7 = vld [vmem:[%s277_s12 + $0x10] sm:$0xff]   ;;  %s303_s28 = sadd.s32 %s962_s27, %s1376_s24 }
  0x18   : > { %1045 = vmatprep.mubr.msk.bf16.mxu1 %vm359_vm0, %v1158_v4  ;;  %v576_v6 = vrot.slane %v1158_v4, 4  ;;  %v577_v8 = vrot.slane %v1159_v5, 4  ;;  %v1163_v9 = vld [vmem:[%s277_s12 + $0x18] sm:$0xff]   ;;  %v579_v10 = vrot.slane %v1162_v7, 4  ;;  %v449_v11 = vshrl.u32 %v1158_v4, 16  ;;  %v1164_v18 = vld [vmem:[%s293_s23] sm:$0xff]  }
  0x19   : > { %1046 = vmatmul.mubr.msk.bf16.vlgmr.msra.gmra.mrb[0].mxu1 %vm359_vm0, %v1159_v5  ;;  %v451_v12 = vshll.u32 %v1158_v4, 16  ;;  %v455_v13 = vshll.u32 %v1159_v5, 16  ;;  %v581_v15 = vrot.slane %v1163_v9, 4  ;;  %v459_v16 = vshrl.u32 %v1159_v5, 16  ;;  %s963_s29 = sshll.u32 %s303_s28, 2 }
  0x1a   : > { %1054 = vmatpush3.bf16.msra.mxu1 %v1160_v2  ;;  %1049 = vmatprep.mubr.msk.bf16.mxu1 %vm359_vm0, %v1162_v7  ;;  %v578_v14 = vsel %vm575_vm1, %v576_v6, %v577_v8  ;;  %v580_v17 = vsel %vm575_vm1, %v577_v8, %v579_v10  ;;  %v462_v22 = vshll.u32 %v1162_v7, 16  ;;  %v680_v23 = vrot.slane %v449_v11, 4  ;;  %s1323_s5 = scalar_lea.vmem %s1360_s4, %s963_s29 }
  0x1b   : > { %1065 = vmatprep.mubr.msk.bf16.mxu0 %vm359_vm0, %v578_v14  ;;  %v453_v19 = vrot.slane %v451_v12, 1  ;;  %v582_v20 = vsel %vm575_vm1, %v579_v10, %v581_v15  ;;  %v457_v21 = vrot.slane %v455_v13, 1  ;;  %v583_v24 = vrot.slane %v1164_v18, 4 }
  0x1c   : > { %1066 = vmatmul.mubr.msk.bf16.vlgmr.msra.gmra.mrb[0].mxu0 %vm359_vm0, %v580_v17  ;;  %v681_v26 = vrot.slane %v451_v12, 5  ;;  %v683_v27 = vrot.slane %v459_v16, 4  ;;  %v684_v28 = vrot.slane %v455_v13, 5  ;;  %v466_v29 = vshrl.u32 %v1162_v7, 16 }
  0x1d   : > { %1074 = vmatpush3.bf16.msra.mxu0 %v1161_v3  ;;  %1069 = vmatprep.mubr.msk.bf16.mxu0 %vm359_vm0, %v582_v20  ;;  %v454_v25 = vor.u32 %v453_v19, %v449_v11  ;;  %v469_v32 = vshll.u32 %v1163_v9, 16  ;;  %v461_v33 = vor.u32 %v459_v16, %v457_v21  ;;  %v464_v34 = vrot.slane %v462_v22, 1 }
  0x1e   : > { %v682_v31 = vor.u32 %v681_v26, %v680_v23  ;;  %v685_v35 = vor.u32 %v684_v28, %v683_v27  ;;  %v584_v36 = vsel %vm575_vm1, %v581_v15, %v583_v24  ;;  %v687_v37 = vrot.slane %v466_v29, 4 }
  0x1f   : > { %v458_v30 = vsel %vm448_vm2, %v454_v25, %v457_v21  ;;  %v688_v38 = vrot.slane %v462_v22, 5  ;;  %v473_v39 = vshrl.u32 %v1163_v9, 16  ;;  %v468_v41 = vor.u32 %v466_v29, %v464_v34 }
  0x20   : > { %v686_v40 = vsel %vm679_vm3, %v682_v31, %v685_v35  ;;  %v471_v42 = vrot.slane %v469_v32, 1  ;;  %v692_v43 = vrot.slane %v469_v32, 5  ;;  %v465_v45 = vsel %vm448_vm2, %v461_v33, %v464_v34 }
  0x21   : > { %1050 = vmatmul.mubr.msk.bf16.gmra.mrb[4].mxu1 %vm359_vm0, %v1163_v9  ;;  %v691_v44 = vrot.slane %v473_v39, 4  ;;  %v689_v46 = vor.u32 %v688_v38, %v687_v37  ;;  %v477_v47 = vshll.u32 %v1164_v18, 16  ;;  %v695_v48 = vshrl.u32 %v1164_v18, 16 }
  0x22   : > { %1055 = vmatprep.mubr.msk.bf16.mxu1 %vm359_vm0, %v458_v30  ;;  %v472_v49 = vsel %vm448_vm2, %v468_v41, %v471_v42  ;;  %v475_v51 = vor.u32 %v473_v39, %v471_v42 }
  0x23   : > { %v693_v50 = vor.u32 %v692_v43, %v691_v44  ;;  %v690_v52 = vsel %vm679_vm3, %v685_v35, %v689_v46  ;;  %v479_v53 = vrot.slane %v477_v47, 1  ;;  %v697_v54 = vrot.slane %v695_v48, 4 }
  0x24   : > { %1070 = vmatmul.mubr.msk.bf16.gmra.mrb[4].mxu0 %vm359_vm0, %v584_v36  ;;  %v698_v55 = vrot.slane %v477_v47, 5 }
  0x25   : > { %1075 = vmatprep.mubr.msk.bf16.mxu0 %vm359_vm0, %v686_v40  ;;  %v694_v56 = vsel %vm679_vm3, %v689_v46, %v693_v50  ;;  %v480_v57 = vsel %vm448_vm2, %v475_v51, %v479_v53 }
  0x26   : > { %v699_v58 = vor.u32 %v698_v55, %v697_v54 }
  0x28   : > { %v700_v59 = vsel %vm679_vm3, %v693_v50, %v699_v58 }
  0x29   : > { %1056 = vmatmul.mubr.msk.bf16.vlgmr.msra.gmra.mrb[0].mxu1 %vm359_vm0, %v465_v45 }
  0x2a   : > { %1059 = vmatprep.mubr.msk.bf16.mxu1 %vm359_vm0, %v472_v49 }
  0x2c   : > { %1076 = vmatmul.mubr.msk.bf16.vlgmr.msra.gmra.mrb[0].mxu0 %vm359_vm0, %v690_v52 }
  0x2d   : > { %1079 = vmatprep.mubr.msk.bf16.mxu0 %vm359_vm0, %v694_v56 }
  0x31   : > { %1060 = vmatmul.mubr.msk.bf16.gmra.mrb[4].mxu1 %vm359_vm0, %v480_v57 }
  0x34   : > { %1080 = vmatmul.mubr.msk.bf16.gmra.mrb[4].mxu0 %vm359_vm0, %v700_v59 }
  0xfc   : > { %v1057_v61 = vpop.f32.mrb[0].mxu1 }
  0xfd   : > { %v1083_v62 = vadd.f32 %v1057_v61, %v969_v60  ;;  %v533_v63 = vpop.f32.mrb[1].mxu1 }
  0xfe   : > { %v1085_v0 = vadd.f32 %v969_v60, %v533_v63  ;;  %v1058_v1 = vpop.f32.mrb[2].mxu1 }
  0xff   : > { %v1087_v2 = vadd.f32 %v1058_v1, %v969_v60  ;;  %v536_v3 = vpop.f32.mrb[3].mxu1  ;;  %v1077_v5 = vpop.f32.mrb[0].mxu0 }
 0x100   : > { %v1089_v4 = vadd.f32 %v969_v60, %v536_v3  ;;  %v1084_v6 = vadd.f32 %v1083_v62, %v1077_v5  ;;  %v753_v7 = vpop.f32.mrb[1].mxu0 }
 0x101   : > { %v1086_v8 = vadd.f32 %v1085_v0, %v753_v7  ;;  %v1078_v9 = vpop.f32.mrb[2].mxu0 }
 0x102   : > { %v794_v10 = vmax.f32 %v1084_v6, 0.0  ;;  %v1088_v11 = vadd.f32 %v1087_v2, %v1078_v9  ;;  %v756_v12 = vpop.f32.mrb[3].mxu0 }
 0x103   : > { %v792_v13 = vmax.f32 %v1086_v8, 0.0  ;;  %v1090_v14 = vadd.f32 %v1089_v4, %v756_v12 }
 0x104   : > { %v1061_v15 = vpop.f32.mrb[4].mxu1  ;;  %v1015_v16 = vpack.c.bf16 %v794_v10, %v794_v10  ;;  %v795_v17 = vmax.f32 %v1088_v11, 0.0 }
 0x105   : > { %v1091_v18 = vadd.f32 %v1061_v15, %v969_v60  ;;  %v549_v19 = vpop.f32.mrb[5].mxu1  ;;  %v1013_v20 = vpack.c.bf16 %v792_v13, %v792_v13  ;;  %v793_v21 = vmax.f32 %v1090_v14, 0.0 }
 0x106   : > { %v1093_v22 = vadd.f32 %v969_v60, %v549_v19  ;;  %v1062_v23 = vpop.f32.mrb[6].mxu1  ;;  %835 = vst.msk [vmem:[%s1323_s5 + $0x8] sm:$0xf] %vm832_vm4, %v1015_v16  ;;  %v1016_v24 = vpack.c.bf16 %v795_v17, %v795_v17 }
 0x107   : > { %v1095_v25 = vadd.f32 %v1062_v23, %v969_v60  ;;  %v552_v26 = vpop.f32.mrb[7].mxu1  ;;  %833 = vst.msk [vmem:[%s1323_s5] sm:$0xf] %vm832_vm4, %v1013_v20  ;;  %v1014_v27 = vpack.c.bf16 %v793_v21, %v793_v21  ;;  %v1081_v29 = vpop.f32.mrb[4].mxu0 }
 0x108   : > { %v1097_v28 = vadd.f32 %v969_v60, %v552_v26  ;;  %836 = vst.msk [vmem:[%s1323_s5 + $0xc] sm:$0xf] %vm832_vm4, %v1016_v24  ;;  %v1092_v30 = vadd.f32 %v1091_v18, %v1081_v29  ;;  %v769_v31 = vpop.f32.mrb[5].mxu0 }
 0x109   : > { %834 = vst.msk [vmem:[%s1323_s5 + $0x4] sm:$0xf] %vm832_vm4, %v1014_v27  ;;  %v1094_v32 = vadd.f32 %v1093_v22, %v769_v31  ;;  %v1082_v33 = vpop.f32.mrb[6].mxu0 }
 0x10a   : > { %v798_v34 = vmax.f32 %v1092_v30, 0.0  ;;  %v1096_v35 = vadd.f32 %v1095_v25, %v1082_v33  ;;  %v772_v36 = vpop.f32.mrb[7].mxu0 }
 0x10b   : > { %v796_v37 = vmax.f32 %v1094_v32, 0.0  ;;  %v1098_v38 = vadd.f32 %v1097_v28, %v772_v36 }
 0x10c   : > { %v1019_v39 = vpack.c.bf16 %v798_v34, %v798_v34  ;;  %v799_v40 = vmax.f32 %v1096_v35, 0.0 }
 0x10d   : > { %v1017_v41 = vpack.c.bf16 %v796_v37, %v796_v37  ;;  %v797_v42 = vmax.f32 %v1098_v38, 0.0 }
 0x10e   : > { %839 = vst.msk [vmem:[%s1323_s5 + $0x18] sm:$0xf] %vm832_vm4, %v1019_v39  ;;  %v1020_v43 = vpack.c.bf16 %v799_v40, %v799_v40 }
 0x10f   : > { %837 = vst.msk [vmem:[%s1323_s5 + $0x10] sm:$0xf] %vm832_vm4, %v1017_v41  ;;  %v1018_v44 = vpack.c.bf16 %v797_v42, %v797_v42 }
 0x110   : > { %840 = vst.msk [vmem:[%s1323_s5 + $0x1c] sm:$0xf] %vm832_vm4, %v1020_v43 }
 0x111   : > { %838 = vst.msk [vmem:[%s1323_s5 + $0x14] sm:$0xf] %vm832_vm4, %v1018_v44 }
 0x112 PF: > { %s14_s19 = sadd.s32 1, %s1203_s19   ;;  %s1361_s15 = smov %s1195_s17 }
 0x113   : > { %p11_p9 = scmp.ge.s32.totalorder %s14_s19, 6   ;;  %s1362_s16 = smov %s1199_s18 }
 0x114   : > { %s1363_s17 = smov %s1366_s20  ;;  %s1364_s18 = smov %s1370_s21 }
 0x115   :  { %13 = sbr.rel (!%p11_p9) target bundleno = 3 (0x3), region = 72 }

// kernel: conv2d_subsampling_forward.5
= control target key start
LH: loop header
LB: loop body
LE: loop exit
PB: predicated region body
PF: predicated region fallthrough
CT: control target
= control target key end

     0   :  { %v108_v0 = vmov 0.0   ;;  %vm39_vm0 = vcmask 1043456   ;;  %vm109_vm1 = vmmov 0   ;;  %vm35_vm2 = vcmask 195584   ;;  %s145_s1 = inlined_call_operand.vmem [shape: bf16[24,32], index: 1, kind: input, shape index: {}]   ;;  %s146_s0 = inlined_call_operand.vmem [shape: bf16[8,24], index: 0, kind: input, shape index: {}]   ;;  %s147_s2 = inlined_call_operand.vmem [shape: f32[1,32], index: 2, kind: input, shape index: {}]   ;;  %s148_s3 = inlined_call_operand.vmem [shape: f32[8,32], index: 3, kind: output, shape index: {}]  }
   0x1   :  { %96 = vmatprep.subr.bf16.mxu0 %v108_v0  ;;  %v106_v1 = vld [vmem:[%s145_s1] sm:$0xff]   ;;  %100 = vmatprep.mubr.msk.bf16.mxu0 %vm109_vm1, %v108_v0  ;;  %v107_v2 = vld [vmem:[%s145_s1 + $0x8] ss:$0 sps:$4 sm:$0xff]   ;;  %vm83_vm3 = vcmask 261120  }
   0x2   :  { %97 = vmatpush3.bf16.msra.mxu0 %v106_v1  ;;  %v41_v3 = vsel %vm39_vm0, %v107_v2, 0  ;;  %v15_v4 = vld [vmem:[%s146_s0] sm:$0xf] }
   0x3   :  { %98 = vmatprep.subr.bf16.mxu0 %v108_v0  ;;  %v89_v5 = vld [vmem:[%s147_s2] ss:$0 sm:$0xff] }
   0x6   :  { %99 = vmatpush3.bf16.msra.mxu0 %v41_v3 }
   0x9   :  { %101 = vmatmul.mubr.msk.bf16.vlgmr.msra.gmra.mrb[0].mxu0 %vm35_vm2, %v15_v4 }
  0xdc   :  { %v77_v6 = vpop.f32.mrb[0].mxu0 }
  0xdd   :  { %v78_v7 = vadd.f32 %v89_v5, %v77_v6  ;;  %v102_v8 = vpop.f32.mrb[1].mxu0 }
  0xde   :  { %v80_v9 = vpop.f32.mrb[2].mxu0 }
  0xdf   :  { %84 = vst.msk [vmem:[%s148_s3] sm:$0xff] %vm83_vm3, %v78_v7  ;;  %v103_v10 = vpop.f32.mrb[3].mxu0 }

// kernel: conv2d_subsampling_forward.4
= control target key start
LH: loop header
LB: loop body
LE: loop exit
PB: predicated region body
PF: predicated region fallthrough
CT: control target
= control target key end

     0   :  { %s1224_s15 = smov 0   ;;  %s1226_s16 = smov 0   ;;  %s1343_s0 = inlined_call_operand.vmem [shape: bf16[2,128,32], index: 0, kind: input, shape index: {}, may-alias: {0,1}]   ;;  %s1344_s1 = inlined_call_operand.vmem [shape: bf16[2,128,32], index: 1, kind: input, shape index: {}, may-alias: {0,1}]   ;;  %s1345_s2 = inlined_call_operand.vmem [shape: bf16[4,32,8], index: 2, kind: input, shape index: {}]   ;;  %s1346_s3 = inlined_call_operand.vmem [shape: f32[1,8], index: 3, kind: input, shape index: {}]   ;;  %s1347_s4 = inlined_call_operand.vmem [shape: bf16[2,64,8], index: 4, kind: output, shape index: {}]  }
   0x1   :  { %s1228_s17 = smov 0  }
   0x2 LB: > { %s26_s18 = sadd.s32 1, %s1193_s16  ;;  %p962_p0 = scmp.ge.s32.totalorder %s1197_s17, 1  ;;  %s1197_s17 = sphi %s1228_s17, %s14_s17   ;;  %s1193_s16 = sphi %s1226_s16, %s1349_s16   ;;  %s1189_s15 = sphi %s1224_s15, %s1348_s15  }
   0x3   : > { %p28_p1 = scmp.ge.s32.totalorder %s26_s18, 2  ;;  %p208_p2 = scmp.lt.s32.totalorder %s1197_s17, 3 }
   0x5   : > { %s1351_s18 = smov (%p28_p1, %s26_s18), 0  ;;  %p209_p3 = pnand %p962_p0, %p208_p2 }
   0x6   : > { %v1162_v0 = vld [vmem:[%s1345_s2] sm:$0xff] (!%p209_p3)   ;;  %p254_p4 = scmp.lt.s32.totalorder (!%p209_p3), %s1189_s15, 1  ;;  %v1164_v2 = vld [vmem:[%s1345_s2 + $0x8] sm:$0xff] (!%p209_p3)   ;;  %vm347_vm0 = vcmask (!%p209_p3), 261120   ;;  %v1168_v4 = vld [vmem:[%s1345_s2 + $0x10] sm:$0xff] (!%p209_p3)   ;;  %vm573_vm1 = vcmask (!%p209_p3), 1043456  }
   0x7   : > { %212 = sbr.rel (%p209_p3) target bundleno = 268 (0x10c), region = 36  ;;  %v1163_v1 = vld [vmem:[%s1345_s2 + $0x20] sm:$0xff] (!%p209_p3)   ;;  %1058 = vmatprep.subr.bf16.mxu1 (!%p209_p3), %v1162_v0  ;;  %v1165_v3 = vld [vmem:[%s1345_s2 + $0x28] sm:$0xff] (!%p209_p3)   ;;  %v1170_v5 = vld [vmem:[%s1345_s2 + $0x30] sm:$0xff] (!%p209_p3)   ;;  %vm438_vm2 = vsmask.f32 (!%p209_p3), 7424 }
   0x8   : > { %1059 = vmatpush3.bf16.msra.mxu1 (!%p209_p3), %v1162_v0  ;;  %1082 = vmatprep.subr.bf16.mxu0 (!%p209_p3), %v1163_v1  ;;  %v1172_v13 = vld [vmem:[%s1345_s2 + $0x18] sm:$0xff] (!%p209_p3)   ;;  %vm685_vm3 = vsmask.f32 (!%p209_p3), 3328  ;;  %v974_v0 = vld [vmem:[%s1346_s3] ss:$0 sm:$0xff] (!%p209_p3)  ;;  %vm844_vm4 = vcmask (!%p209_p3), 60416  }
   0x9   : > { %1083 = vmatpush3.bf16.msra.mxu0 (!%p209_p3), %v1163_v1  ;;  %1060 = vmatprep.subr.bf16.mxu1 (!%p209_p3), %v1164_v2  ;;  %v1174_v18 = vld [vmem:[%s1345_s2 + $0x38] sm:$0xff] (!%p209_p3)  }
   0xa   : > { %1084 = vmatprep.subr.bf16.mxu0 (!%p209_p3), %v1165_v3 }
   0xc   : > { %1061 = vmatpush3.bf16.msra.mxu1 (!%p209_p3), %v1164_v2 }
   0xd   : > { %1085 = vmatpush3.bf16.msra.mxu0 (!%p209_p3), %v1165_v3  ;;  %1070 = vmatprep.subr.bf16.mxu1 (!%p209_p3), %v1168_v4 }
   0xe   : > { %s1353_s15 = smov (!%p254_p4, %s1189_s15), 1  ;;  %1094 = vmatprep.subr.bf16.mxu0 %v1170_v5 }
   0xf   : > { %s1021_s27 = sshll.u32 %s1353_s15, 6  ;;  %s1024_s23 = sshll.u32 %s1353_s15, 5 }
  0x10   : > { %s261_s6 = scalar_lea.vmem %s1343_s0, %s1021_s27  ;;  %s1023_s9 = sadd.s32 32, %s1021_s27 }
  0x11   : > { %v1166_v6 = vld [vmem:[%s261_s6] sm:$0xff]   ;;  %v1167_v7 = vld [vmem:[%s261_s6 + $0x8] sm:$0xff]   ;;  %v1169_v9 = vld [vmem:[%s261_s6 + $0x10] sm:$0xff]   ;;  %s273_s12 = scalar_lea.vmem %s1344_s1, %s1023_s9  ;;  %s1316_s26 = scalar_lea.vmem %s1347_s4, %s1024_s23 }
  0x12   : > { %1062 = vmatprep.mubr.msk.bf16.mxu1 %vm347_vm0, %v1166_v6  ;;  %v574_v8 = vrot.slane %v1166_v6, 4  ;;  %v575_v10 = vrot.slane %v1167_v7, 4  ;;  %v1270_v11 = vld [vmem:[%s261_s6 + $0x18] sm:$0xff]   ;;  %v577_v12 = vrot.slane %v1169_v9, 4  ;;  %v1173_v16 = vld [vmem:[%s273_s12] sm:$0xff]   ;;  %v439_v19 = vshrl.u32 %v1166_v6, 16 }
  0x13   : > { %1063 = vmatmul.mubr.msk.bf16.vlgmr.msra.gmra.mrb[0].mxu1 %vm347_vm0, %v1167_v7  ;;  %v579_v15 = vrot.slane %v1270_v11, 4  ;;  %v581_v21 = vrot.slane %v1173_v16, 4  ;;  %v441_v22 = vshll.u32 %v1166_v6, 16  ;;  %v445_v23 = vshll.u32 %v1167_v7, 16 }
  0x14   : > { %1071 = vmatpush3.bf16.msra.mxu1 %v1168_v4  ;;  %v576_v14 = vsel %vm573_vm1, %v574_v8, %v575_v10  ;;  %1066 = vmatprep.mubr.msk.bf16.mxu1 %vm347_vm0, %v1169_v9  ;;  %v578_v17 = vsel %vm573_vm1, %v575_v10, %v577_v12  ;;  %v449_v24 = vshrl.u32 %v1167_v7, 16  ;;  %v452_v25 = vshll.u32 %v1169_v9, 16 }
  0x15   : > { %1086 = vmatprep.mubr.msk.bf16.mxu0 %vm347_vm0, %v576_v14  ;;  %1072 = vmatprep.subr.bf16.mxu1 %v1172_v13  ;;  %v580_v20 = vsel %vm573_vm1, %v577_v12, %v579_v15  ;;  %v443_v26 = vrot.slane %v441_v22, 1  ;;  %v686_v27 = vrot.slane %v439_v19, 4  ;;  %v687_v28 = vrot.slane %v441_v22, 5 }
  0x16   : > { %1087 = vmatmul.mubr.msk.bf16.vlgmr.msra.gmra.mrb[0].mxu0 %vm347_vm0, %v578_v17  ;;  %v582_v29 = vsel %vm573_vm1, %v579_v15, %v581_v21  ;;  %v447_v30 = vrot.slane %v445_v23, 1  ;;  %v689_v31 = vrot.slane %v449_v24, 4  ;;  %v690_v32 = vrot.slane %v445_v23, 5 }
  0x17   : > { %1095 = vmatpush3.bf16.msra.mxu0 %v1170_v5  ;;  %1090 = vmatprep.mubr.msk.bf16.mxu0 %vm347_vm0, %v580_v20  ;;  %v444_v33 = vor.u32 %v443_v26, %v439_v19  ;;  %v454_v34 = vrot.slane %v452_v25, 1  ;;  %v688_v35 = vor.u32 %v687_v28, %v686_v27  ;;  %v456_v36 = vshrl.u32 %v1169_v9, 16 }
  0x18   : > { %1073 = vmatpush3.bf16.msra.mxu1 %v1172_v13  ;;  %1096 = vmatprep.subr.bf16.mxu0 %v1174_v18  ;;  %v691_v37 = vor.u32 %v690_v32, %v689_v31  ;;  %v694_v38 = vrot.slane %v452_v25, 5  ;;  %v459_v39 = vshll.u32 %v1270_v11, 16  ;;  %v463_v40 = vshrl.u32 %v1270_v11, 16 }
  0x19   : > { %v448_v41 = vsel %vm438_vm2, %v444_v33, %v447_v30  ;;  %v451_v42 = vor.u32 %v449_v24, %v447_v30  ;;  %v693_v43 = vrot.slane %v456_v36, 4  ;;  %v458_v45 = vor.u32 %v456_v36, %v454_v34 }
  0x1a   : > { %v692_v44 = vsel %vm685_vm3, %v688_v35, %v691_v37  ;;  %v461_v46 = vrot.slane %v459_v39, 1  ;;  %v697_v47 = vrot.slane %v463_v40, 4  ;;  %v698_v48 = vrot.slane %v459_v39, 5 }
  0x1b   : > { %1067 = vmatmul.mubr.msk.bf16.gmra.mrb[4].mxu1 %vm347_vm0, %v1270_v11  ;;  %1097 = vmatpush3.bf16.msra.mxu0 %v1174_v18  ;;  %v695_v49 = vor.u32 %v694_v38, %v693_v43  ;;  %v467_v50 = vshll.u32 %v1173_v16, 16  ;;  %v701_v51 = vshrl.u32 %v1173_v16, 16  ;;  %v455_v52 = vsel %vm438_vm2, %v451_v42, %v454_v34 }
  0x1c   : > { %1074 = vmatprep.mubr.msk.bf16.mxu1 %vm347_vm0, %v448_v41  ;;  %v699_v53 = vor.u32 %v698_v48, %v697_v47  ;;  %v462_v54 = vsel %vm438_vm2, %v458_v45, %v461_v46  ;;  %v465_v58 = vor.u32 %v463_v40, %v461_v46 }
  0x1d   : > { %v696_v55 = vsel %vm685_vm3, %v691_v37, %v695_v49  ;;  %v703_v56 = vrot.slane %v701_v51, 4  ;;  %v704_v57 = vrot.slane %v467_v50, 5  ;;  %v469_v59 = vrot.slane %v467_v50, 1 }
  0x1e   : > { %1091 = vmatmul.mubr.msk.bf16.gmra.mrb[4].mxu0 %vm347_vm0, %v582_v29  ;;  %v700_v60 = vsel %vm685_vm3, %v695_v49, %v699_v53 }
  0x1f   : > { %1098 = vmatprep.mubr.msk.bf16.mxu0 %vm347_vm0, %v692_v44  ;;  %v705_v61 = vor.u32 %v704_v57, %v703_v56  ;;  %v470_v62 = vsel %vm438_vm2, %v465_v58, %v469_v59 }
  0x21   : > { %v706_v63 = vsel %vm685_vm3, %v699_v53, %v705_v61 }
  0x23   : > { %1075 = vmatmul.mubr.msk.bf16.vlgmr.msra.gmra.mrb[0].mxu1 %vm347_vm0, %v455_v52 }
  0x24   : > { %1078 = vmatprep.mubr.msk.bf16.mxu1 %vm347_vm0, %v462_v54 }
  0x26   : > { %1099 = vmatmul.mubr.msk.bf16.vlgmr.msra.gmra.mrb[0].mxu0 %vm347_vm0, %v696_v55 }
  0x27   : > { %1102 = vmatprep.mubr.msk.bf16.mxu0 %vm347_vm0, %v700_v60 }
  0x2b   : > { %1079 = vmatmul.mubr.msk.bf16.gmra.mrb[4].mxu1 %vm347_vm0, %v470_v62 }
  0x2e   : > { %1103 = vmatmul.mubr.msk.bf16.gmra.mrb[4].mxu0 %vm347_vm0, %v706_v63 }
  0xf6   : > { %v1076_v1 = vpop.f32.mrb[0].mxu1 }
  0xf7   : > { %v1106_v2 = vadd.f32 %v1076_v1, %v974_v0  ;;  %v529_v3 = vpop.f32.mrb[1].mxu1 }
  0xf8   : > { %v1108_v4 = vadd.f32 %v974_v0, %v529_v3  ;;  %v1077_v5 = vpop.f32.mrb[2].mxu1 }
  0xf9   : > { %v1110_v6 = vadd.f32 %v1077_v5, %v974_v0  ;;  %v1100_v7 = vpop.f32.mrb[0].mxu0  ;;  %v532_v8 = vpop.f32.mrb[3].mxu1 }
  0xfa   : > { %v1107_v9 = vadd.f32 %v1106_v2, %v1100_v7  ;;  %v1112_v10 = vadd.f32 %v974_v0, %v532_v8  ;;  %v765_v11 = vpop.f32.mrb[1].mxu0 }
  0xfb   : > { %v1109_v12 = vadd.f32 %v1108_v4, %v765_v11  ;;  %v1101_v13 = vpop.f32.mrb[2].mxu0 }
  0xfc   : > { %v806_v14 = vmax.f32 %v1107_v9, 0.0  ;;  %v1111_v15 = vadd.f32 %v1110_v6, %v1101_v13  ;;  %v768_v16 = vpop.f32.mrb[3].mxu0 }
  0xfd   : > { %v804_v17 = vmax.f32 %v1109_v12, 0.0  ;;  %v1113_v18 = vadd.f32 %v1112_v10, %v768_v16 }
  0xfe   : > { %v1027_v19 = vpack.c.bf16 %v806_v14, %v806_v14  ;;  %v807_v20 = vmax.f32 %v1111_v15, 0.0  ;;  %v1080_v21 = vpop.f32.mrb[4].mxu1 }
  0xff   : > { %v1025_v22 = vpack.c.bf16 %v804_v17, %v804_v17  ;;  %v805_v23 = vmax.f32 %v1113_v18, 0.0  ;;  %v1114_v24 = vadd.f32 %v1080_v21, %v974_v0  ;;  %v545_v25 = vpop.f32.mrb[5].mxu1 }
 0x100   : > { %847 = vst.msk [vmem:[%s1316_s26 + $0x8] sm:$0xf] %vm844_vm4, %v1027_v19  ;;  %v1028_v26 = vpack.c.bf16 %v807_v20, %v807_v20  ;;  %v1116_v27 = vadd.f32 %v974_v0, %v545_v25  ;;  %v1081_v28 = vpop.f32.mrb[6].mxu1 }
 0x101   : > { %845 = vst.msk [vmem:[%s1316_s26] sm:$0xf] %vm844_vm4, %v1025_v22  ;;  %v1026_v29 = vpack.c.bf16 %v805_v23, %v805_v23  ;;  %v1118_v30 = vadd.f32 %v1081_v28, %v974_v0  ;;  %v1104_v31 = vpop.f32.mrb[4].mxu0  ;;  %v548_v32 = vpop.f32.mrb[7].mxu1 }
 0x102   : > { %848 = vst.msk [vmem:[%s1316_s26 + $0xc] sm:$0xf] %vm844_vm4, %v1028_v26  ;;  %v1115_v33 = vadd.f32 %v1114_v24, %v1104_v31  ;;  %v1120_v34 = vadd.f32 %v974_v0, %v548_v32  ;;  %v781_v35 = vpop.f32.mrb[5].mxu0 }
 0x103   : > { %846 = vst.msk [vmem:[%s1316_s26 + $0x4] sm:$0xf] %vm844_vm4, %v1026_v29  ;;  %v1117_v36 = vadd.f32 %v1116_v27, %v781_v35  ;;  %v1105_v37 = vpop.f32.mrb[6].mxu0 }
 0x104   : > { %v810_v38 = vmax.f32 %v1115_v33, 0.0  ;;  %v1119_v39 = vadd.f32 %v1118_v30, %v1105_v37  ;;  %v784_v40 = vpop.f32.mrb[7].mxu0 }
 0x105   : > { %v808_v41 = vmax.f32 %v1117_v36, 0.0  ;;  %v1121_v42 = vadd.f32 %v1120_v34, %v784_v40 }
 0x106   : > { %v1031_v43 = vpack.c.bf16 %v810_v38, %v810_v38  ;;  %v811_v44 = vmax.f32 %v1119_v39, 0.0 }
 0x107   : > { %v1029_v45 = vpack.c.bf16 %v808_v41, %v808_v41  ;;  %v809_v46 = vmax.f32 %v1121_v42, 0.0 }
 0x108   : > { %851 = vst.msk [vmem:[%s1316_s26 + $0x18] sm:$0xf] %vm844_vm4, %v1031_v43  ;;  %v1032_v47 = vpack.c.bf16 %v811_v44, %v811_v44 }
 0x109   : > { %849 = vst.msk [vmem:[%s1316_s26 + $0x10] sm:$0xf] %vm844_vm4, %v1029_v45  ;;  %v1030_v48 = vpack.c.bf16 %v809_v46, %v809_v46 }
 0x10a   : > { %852 = vst.msk [vmem:[%s1316_s26 + $0x1c] sm:$0xf] %vm844_vm4, %v1032_v47 }
 0x10b   : > { %850 = vst.msk [vmem:[%s1316_s26 + $0x14] sm:$0xf] %vm844_vm4, %v1030_v48 }
 0x10c PF: > { %s14_s17 = sadd.s32 1, %s1197_s17   ;;  %s1348_s15 = smov %s1193_s16 }
 0x10d   : > { %p11_p5 = scmp.ge.s32.totalorder %s14_s17, 4   ;;  %s1349_s16 = smov %s1351_s18 }
 0x10f   :  { %13 = sbr.rel (!%p11_p5) target bundleno = 2 (0x2), region = 72 }

</bundles_post_ra>
